<compile_context>
chip_gen: v7x
topology: tpu7x:2x2x1
jax: 0.10.0
libtpu: 0.0.40
codegen_flags: <defaults>
</compile_context>

<pallas_src>
import functools

import numpy as np

import jax
import jax.numpy as jnp
from jax.experimental import pallas as pl
from jax.experimental.pallas import tpu as pltpu

GROWTH = 32              # densenet121 growth rate
BN_SIZE = 4              # bottleneck multiplier
BLOCK_CONFIG = (6, 12, 24, 16)
NUM_INIT_FEATURES = 64
EPS = 1e-5

TM, TN, TK = 128, 128, 128

_CPARAMS3 = pltpu.CompilerParams(
    dimension_semantics=("parallel", "parallel", "arbitrary"),
    vmem_limit_bytes=32 * 1024 * 1024)
_CPARAMS2 = pltpu.CompilerParams(
    dimension_semantics=("parallel", "parallel"),
    vmem_limit_bytes=32 * 1024 * 1024)


def _rup(v, m):
    return -(-v // m) * m


def _to_bf16(x):
    return x.astype(jnp.bfloat16)


# ==========================================================================
# Pallas kernels
# ==========================================================================

def _epilogue(acc, osc, obi, out_act, out_dtype):
    y = acc * osc + obi
    if out_act == "relu":
        y = jnp.maximum(y, 0.0)
    elif out_act == "leaky":
        y = jnp.maximum(y, 0.2 * y)          # LeakyReLU(0.2)
    return y.astype(out_dtype)


def _mm_kernel(a_ref, w_ref, isc_ref, ibi_ref, osc_ref, obi_ref, o_ref,
               acc_ref, *, in_act, out_act):
    """Fused (affine+relu on A) -> matmul -> (affine+act) with f32 VMEM acc."""
    k = pl.program_id(2)

    @pl.when(k == 0)
    def _init():
        acc_ref[...] = jnp.zeros_like(acc_ref)

    a = a_ref[...]
    if in_act == "relu":                      # pre-activation BatchNorm + ReLU
        a32 = a.astype(jnp.float32) * isc_ref[...] + ibi_ref[...]
        a = jnp.maximum(a32, 0.0).astype(jnp.bfloat16)
    acc_ref[...] += jnp.dot(a, w_ref[...], preferred_element_type=jnp.float32)

    @pl.when(k == pl.num_programs(2) - 1)
    def _fin():
        o_ref[...] = _epilogue(acc_ref[...], osc_ref[...], obi_ref[...],
                               out_act, o_ref.dtype)


@functools.partial(jax.jit, static_argnames=("in_act", "out_act"))
def _mm_call(a, w, isc, ibi, osc, obi, *, in_act, out_act):
    mp = a.shape[0]
    kb, np_ = w.shape
    grid = (mp // TM, np_ // TN, kb // TK)
    return pl.pallas_call(
        functools.partial(_mm_kernel, in_act=in_act, out_act=out_act),
        grid=grid,
        in_specs=[
            pl.BlockSpec((TM, TK), lambda i, j, k: (i, k)),
            pl.BlockSpec((TK, TN), lambda i, j, k: (k, j)),
            pl.BlockSpec((1, TK), lambda i, j, k: (0, k)),
            pl.BlockSpec((1, TK), lambda i, j, k: (0, k)),
            pl.BlockSpec((1, TN), lambda i, j, k: (0, j)),
            pl.BlockSpec((1, TN), lambda i, j, k: (0, j)),
        ],
        out_specs=pl.BlockSpec((TM, TN), lambda i, j, k: (i, j)),
        out_shape=jax.ShapeDtypeStruct((mp, np_), jnp.bfloat16),
        scratch_shapes=[pltpu.VMEM((TM, TN), jnp.float32)],
        compiler_params=_CPARAMS3,
    )(a, w, isc, ibi, osc, obi)


def _tap_kernel(a0_ref, a1_ref, w_ref, osc_ref, obi_ref, o_ref, acc_ref,
                *, offs, tm, out_act):
    """3x3 stride-1 conv: 9 shifted matmuls accumulated into one VMEM acc.

    a0/a1 are consecutive row tiles of the flattened, spatially padded input;
    tap (di,dj) is a constant row offset di*Wp+dj into their concatenation.
    """
    k = pl.program_id(2)

    @pl.when(k == 0)
    def _init():
        acc_ref[...] = jnp.zeros_like(acc_ref)

    a = jnp.concatenate([a0_ref[...], a1_ref[...]], axis=0)       # (2*tm, TK)
    part = jnp.dot(a[offs[0]:offs[0] + tm, :], w_ref[0],
                   preferred_element_type=jnp.float32)
    for t in range(1, len(offs)):
        off = offs[t]
        part = part + jnp.dot(a[off:off + tm, :], w_ref[t],
                              preferred_element_type=jnp.float32)
    acc_ref[...] += part

    @pl.when(k == pl.num_programs(2) - 1)
    def _fin():
        o_ref[...] = _epilogue(acc_ref[...], osc_ref[...], obi_ref[...],
                               out_act, o_ref.dtype)


@functools.partial(jax.jit, static_argnames=("offs", "tm", "out_act"))
def _tap_call(a, w, osc, obi, *, offs, tm, out_act):
    rp = a.shape[0] - tm                      # a carries one extra halo tile
    ntaps, kb, np_ = w.shape
    grid = (rp // tm, np_ // TN, kb // TK)
    return pl.pallas_call(
        functools.partial(_tap_kernel, offs=offs, tm=tm, out_act=out_act),
        grid=grid,
        in_specs=[
            pl.BlockSpec((tm, TK), lambda i, j, k: (i, k)),
            pl.BlockSpec((tm, TK), lambda i, j, k: (i + 1, k)),
            pl.BlockSpec((ntaps, TK, TN), lambda i, j, k: (0, k, j)),
            pl.BlockSpec((1, TN), lambda i, j, k: (0, j)),
            pl.BlockSpec((1, TN), lambda i, j, k: (0, j)),
        ],
        out_specs=pl.BlockSpec((tm, TN), lambda i, j, k: (i, j)),
        out_shape=jax.ShapeDtypeStruct((rp, np_), jnp.bfloat16),
        scratch_shapes=[pltpu.VMEM((tm, TN), jnp.float32)],
        compiler_params=_CPARAMS3,
    )(a, a, w, osc, obi)


def _pool_kernel(x_ref, o_ref, *, mode, nwin):
    acc = x_ref[0].astype(jnp.float32)
    for t in range(1, nwin):
        v = x_ref[t].astype(jnp.float32)
        acc = jnp.maximum(acc, v) if mode == "max" else acc + v
    if mode == "avg":
        acc = acc * (1.0 / nwin)
    o_ref[...] = acc.astype(o_ref.dtype)


@functools.partial(jax.jit, static_argnames=("mode",))
def _pool_call(stacked, *, mode):
    nwin, mp, cp = stacked.shape
    grid = (mp // TM, cp // TN)
    return pl.pallas_call(
        functools.partial(_pool_kernel, mode=mode, nwin=nwin),
        grid=grid,
        in_specs=[pl.BlockSpec((nwin, TM, TN), lambda i, j: (0, i, j))],
        out_specs=pl.BlockSpec((TM, TN), lambda i, j: (i, j)),
        out_shape=jax.ShapeDtypeStruct((mp, cp), jnp.bfloat16),
        compiler_params=_CPARAMS2,
    )(stacked)


# ==========================================================================
# NN ops built on the kernels (padding / reshape glue stays in plain JAX)
# ==========================================================================

def run_mm_2d(a_padded, op):
    """a_padded: (Mp, Ca) bf16, Mp % TM == 0, Ca >= op weight rows (only the
    first K rows/cols are read via the K grid axis)."""
    return _mm_call(a_padded, op["w"], op["isc"], op["ibi"], op["osc"],
                    op["obi"], in_act=op["in_act"], out_act=op["out_act"])


def conv1x1(x, op):
    n, h, w, c = x.shape
    m = n * h * w
    mp = _rup(m, TM)
    kb = op["w"].shape[0]
    a = jnp.pad(_to_bf16(x).reshape(m, c), ((0, mp - m), (0, kb - c)))
    y = run_mm_2d(a, op)
    return y[:m, :op["cout"]].reshape(n, h, w, op["cout"])


def conv3x3(x, op):
    """3x3, stride 1, pad 1 conv with fused per-channel affine + activation."""
    n, h, w, c = x.shape
    hp, wp = h + 2, w + 2
    kb = op["w"].shape[1]
    xp = jnp.pad(_to_bf16(x), ((0, 0), (1, 1), (1, 1), (0, kb - c)))
    r0 = n * hp * wp
    max_off = 2 * wp + 2
    tm = max(TM, _rup(max_off + 1, TM))       # tap offsets must fit one tile
    rp = _rup(r0, tm)
    a = jnp.pad(xp.reshape(r0, kb), ((0, rp + tm - r0), (0, 0)))
    offs = tuple(di * wp + dj for di in range(3) for dj in range(3))
    y = _tap_call(a, op["w"], op["osc"], op["obi"],
                  offs=offs, tm=tm, out_act=op["out_act"])
    return y[:r0].reshape(n, hp, wp, -1)[:, :h, :w, :op["cout"]]


def conv_im2col(x, op):
    """Stem 7x7/stride-2 conv only.
    # TODO(synk): still uses a wrapper-side im2col; cheap (3 input channels),
    # all stride-1 3x3 convs avoid the HBM im2col blow-up."""
    kh, kw, stride, pad = op["kh"], op["kw"], op["stride"], op["pad"]
    n, h, w, c = x.shape
    xp = jnp.pad(_to_bf16(x), ((0, 0), (pad, pad), (pad, pad), (0, 0)))
    ho = (h + 2 * pad - kh) // stride + 1
    wo = (w + 2 * pad - kw) // stride + 1
    cols = []
    for di in range(kh):
        for dj in range(kw):
            cols.append(xp[:, di:di + stride * ho:stride,
                           dj:dj + stride * wo:stride, :])
    a = jnp.concatenate(cols, axis=-1).reshape(n * ho * wo, kh * kw * c)
    m = n * ho * wo
    mp = _rup(m, TM)
    kb = op["w"].shape[0]
    a = jnp.pad(a, ((0, mp - m), (0, kb - kh * kw * c)))
    y = run_mm_2d(a, op)
    return y[:m, :op["cout"]].reshape(n, ho, wo, op["cout"])


def avgpool_2x2_s2(x):
    n, h, w, c = x.shape
    ho, wo = h // 2, w // 2
    m = n * ho * wo
    # Pure permutation of the input (no 4x window copies).
    v = _to_bf16(x).reshape(n, ho, 2, wo, 2, c)
    v = jnp.transpose(v, (2, 4, 0, 1, 3, 5)).reshape(4, m, c)
    mp, cp = _rup(m, TM), _rup(c, TN)
    v = jnp.pad(v, ((0, 0), (0, mp - m), (0, cp - c)))
    y = _pool_call(v, mode="avg")
    return y[:m, :c].reshape(n, ho, wo, c)


def maxpool_3x3_s2_p1(x):
    n, h, w, c = x.shape
    ho, wo = (h - 1) // 2 + 1, (w - 1) // 2 + 1
    xp = jnp.pad(_to_bf16(x), ((0, 0), (1, 1), (1, 1), (0, 0)),
                 constant_values=-jnp.inf)
    wins = [xp[:, di:di + 2 * ho:2, dj:dj + 2 * wo:2, :]
            for di in range(3) for dj in range(3)]
    m = n * ho * wo
    mp, cp = _rup(m, TM), _rup(c, TN)
    stacked = jnp.stack(wins, 0).reshape(9, m, c)
    stacked = jnp.pad(stacked, ((0, 0), (0, mp - m), (0, cp - c)))
    y = _pool_call(stacked, mode="max")
    return y[:m, :c].reshape(n, ho, wo, c)


def upsample_bilinear_align_corners(x, ho, wo):
    """F.interpolate(mode='bilinear', align_corners=True) equivalent.
    # TODO(synk): pure data movement, done with jnp gathers (no Pallas kernel)."""
    n, h, w, c = x.shape
    xf = x.astype(jnp.float32)

    def _axis(s_in, s_out):
        if s_out == 1:
            pos = jnp.zeros((s_out,), jnp.float32)
        else:
            pos = jnp.arange(s_out, dtype=jnp.float32) * (
                float(s_in - 1) / float(s_out - 1))
        lo = jnp.clip(jnp.floor(pos).astype(jnp.int32), 0, s_in - 1)
        hi = jnp.minimum(lo + 1, s_in - 1)
        return lo, hi, pos - lo.astype(jnp.float32)

    hlo, hhi, hf = _axis(h, ho)
    wlo, whi, wf = _axis(w, wo)
    top = jnp.take(xf, hlo, axis=1)
    bot = jnp.take(xf, hhi, axis=1)
    xh = top + (bot - top) * hf[None, :, None, None]
    left = jnp.take(xh, wlo, axis=2)
    right = jnp.take(xh, whi, axis=2)
    out = left + (right - left) * wf[None, None, :, None]
    return out.astype(jnp.bfloat16)


# ==========================================================================
# Deterministic parameter construction (padded / BN-folded op dicts)
# ==========================================================================

def _row(vec, n):
    out = np.zeros((1, n), np.float32)
    out[0, :vec.shape[0]] = vec
    return jnp.asarray(out)


def make_mm_op(w, *, in_scale=None, in_bias=None, in_act=None,
               out_scale=None, out_bias=None, out_act=None):
    cin, cout = w.shape
    kb, npad = _rup(cin, TK), _rup(cout, TN)
    wp = np.zeros((kb, npad), np.float32)
    wp[:cin, :cout] = w
    if in_scale is None:
        in_scale = np.ones((cin,), np.float32)
    if in_bias is None:
        in_bias = np.zeros((cin,), np.float32)
    if out_scale is None:
        out_scale = np.ones((cout,), np.float32)
    if out_bias is None:
        out_bias = np.zeros((cout,), np.float32)
    return dict(w=jnp.asarray(wp).astype(jnp.bfloat16),
                isc=_row(in_scale, kb), ibi=_row(in_bias, kb),
                osc=_row(out_scale, npad), obi=_row(out_bias, npad),
                in_act=in_act, out_act=out_act, cout=cout)


def make_tap_op(w_hwio, *, out_scale=None, out_bias=None, out_act=None):
    kh, kw, cin, cout = w_hwio.shape
    kb, npad = _rup(cin, TK), _rup(cout, TN)
    wp = np.zeros((kh, kw, kb, npad), np.float32)
    wp[:, :, :cin, :cout] = w_hwio
    wp = wp.reshape(kh * kw, kb, npad)
    if out_scale is None:
        out_scale = np.ones((cout,), np.float32)
    if out_bias is None:
        out_bias = np.zeros((cout,), np.float32)
    return dict(w=jnp.asarray(wp).astype(jnp.bfloat16),
                osc=_row(out_scale, npad), obi=_row(out_bias, npad),
                out_act=out_act, cout=cout)


def make_im2col_op(w_hwio, *, stride, pad, out_scale=None, out_bias=None,
                   out_act=None):
    kh, kw, cin, cout = w_hwio.shape
    op = make_mm_op(w_hwio.reshape(kh * kw * cin, cout),
                    out_scale=out_scale, out_bias=out_bias, out_act=out_act)
    op.update(kh=kh, kw=kw, stride=stride, pad=pad)
    return op


def init_params(seed=0):
    rng = np.random.RandomState(seed)

    def he(shape, fan_in):
        return (rng.standard_normal(shape) *
                np.sqrt(2.0 / fan_in)).astype(np.float32)

    def bn_affine(c):
        gamma = 1.0 + 0.1 * rng.standard_normal(c)
        beta = 0.1 * rng.standard_normal(c)
        mean = 0.1 * rng.standard_normal(c)
        var = 1.0 + 0.1 * rng.uniform(size=c)
        scale = gamma / np.sqrt(var + EPS)
        bias = beta - mean * scale
        return scale.astype(np.float32), bias.astype(np.float32)

    def conv3x3_bias_op(cin, cout, act):
        w = he((3, 3, cin, cout), 9 * cin)
        b = (0.05 * rng.standard_normal(cout)).astype(np.float32)
        return make_tap_op(w, out_bias=b, out_act=act)

    # ----- DenseNet-121 features (color branch) -----
    enc = {}
    s0, b0 = bn_affine(NUM_INIT_FEATURES)
    enc["conv0"] = make_im2col_op(he((7, 7, 3, NUM_INIT_FEATURES), 7 * 7 * 3),
                                  stride=2, pad=3, out_scale=s0, out_bias=b0,
                                  out_act="relu")          # conv0+norm0+relu0
    nf = NUM_INIT_FEATURES
    for bi, n_layers in enumerate(BLOCK_CONFIG):
        layers = []
        for li in range(n_layers):
            cin = nf + li * GROWTH
            s1, b1 = bn_affine(cin)                          # norm1 (pre-act)
            w1 = he((cin, BN_SIZE * GROWTH), cin)            # 1x1 bottleneck
            s2, b2 = bn_affine(BN_SIZE * GROWTH)             # norm2 (fused out)
            w2 = he((3, 3, BN_SIZE * GROWTH, GROWTH), 9 * BN_SIZE * GROWTH)
            layers.append(dict(
                op1=make_mm_op(w1, in_scale=s1, in_bias=b1, in_act="relu",
                               out_scale=s2, out_bias=b2, out_act="relu"),
                op2=make_tap_op(w2)))
        enc[f"denseblock{bi + 1}"] = layers
        nf += n_layers * GROWTH
        if bi != len(BLOCK_CONFIG) - 1:
            st, bt = bn_affine(nf)
            enc[f"transition{bi + 1}"] = make_mm_op(
                he((nf, nf // 2), nf), in_scale=st, in_bias=bt, in_act="relu")
            nf //= 2
    # norm5 (features[12]) is not consumed by the Decoder -> not built.

    # ----- depth encoder -----
    dep = {"In": dict(opA=conv3x3_bias_op(1, 4, "leaky"),
                      opB=conv3x3_bias_op(4, 4, "leaky"))}
    for i, (ci, co) in enumerate([(4, 8), (8, 16), (16, 32), (32, 64),
                                  (64, 64)]):
        dep[f"d{i}"] = dict(opA=conv3x3_bias_op(ci, co, "leaky"),
                            opB=conv3x3_bias_op(co, co, "leaky"))

    # ----- decoder -----
    feats = 512
    dec = {}
    dec["inconv"] = make_mm_op(
        he((1024 + 64, feats), 1024 + 64),
        out_bias=(0.05 * rng.standard_normal(feats)).astype(np.float32))
    up_cfg = [(feats + 64 + 256, feats // 2),
              (feats // 2 + 32 + 128, feats // 4),
              (feats // 4 + 16 + 64, feats // 8),
              (feats // 8 + 8 + 64, feats // 16),
              (feats // 16 + 4 + 3, feats // 32)]
    for i, (ci, co) in enumerate(up_cfg):
        dec[f"up{i + 1}"] = dict(opA=conv3x3_bias_op(ci, co, "leaky"),
                                 opB=conv3x3_bias_op(co, co, "leaky"))
    dec["outconv"] = conv3x3_bias_op(feats // 32, 1, None)

    return dict(encoder=enc, encoder_depth=dep, decoder=dec)


# ==========================================================================
# Forward pass, mirroring Model.forward
# ==========================================================================

def dense_block(x, layers):
    n, h, w, c0 = x.shape
    m = n * h * w
    mp = _rup(m, TM)
    ctot = c0 + GROWTH * len(layers)
    cp = _rup(ctot, TN)
    # Single channel buffer; each layer writes its 32 new channels in place.
    buf = jnp.zeros((mp, cp), jnp.bfloat16)
    buf = jax.lax.dynamic_update_slice(buf, _to_bf16(x).reshape(m, c0), (0, 0))
    for li, lp in enumerate(layers):
        # norm1+relu fused as the matmul prologue; norm2+relu as its epilogue.
        y = run_mm_2d(buf, lp["op1"])                    # (mp, 128) bottleneck
        y = y[:m].reshape(n, h, w, BN_SIZE * GROWTH)
        z = conv3x3(y, lp["op2"])                        # (n,h,w,32)
        buf = jax.lax.dynamic_update_slice(
            buf, z.reshape(m, GROWTH), (0, c0 + GROWTH * li))
    return buf[:m, :ctot].reshape(n, h, w, ctot)


def transition(x, op):
    return avgpool_2x2_s2(conv1x1(x, op))     # norm+relu fused in the conv


def densenet_features(x_color, enc):
    relu0 = conv_im2col(x_color, enc["conv0"])
    pool0 = maxpool_3x3_s2_p1(relu0)
    feats = {0: x_color, 3: relu0, 4: pool0}
    y = pool0
    for bi in range(len(BLOCK_CONFIG)):
        y = dense_block(y, enc[f"denseblock{bi + 1}"])
        if bi != len(BLOCK_CONFIG) - 1:
            y = transition(y, enc[f"transition{bi + 1}"])
            if bi == 0:
                feats[6] = y
            elif bi == 1:
                feats[8] = y
    feats[11] = y                               # denseblock4 output
    return feats


def conv_pair(x, p):
    return conv3x3(conv3x3(x, p["opA"]), p["opB"])


def encoder_depth_forward(x_depth, dep):
    x_in = conv_pair(x_depth, dep["In"])
    feats = [x_in]
    for i in range(5):
        feats.append(conv_pair(avgpool_2x2_s2(feats[-1]), dep[f"d{i}"]))
    return feats


def _cat(a, b):
    return jnp.concatenate([_to_bf16(a), _to_bf16(b)], axis=-1)


def upsample_block(x, skip, p):
    up = upsample_bilinear_align_corners(x, skip.shape[1], skip.shape[2])
    return conv_pair(_cat(up, skip), p)


def decoder_forward(fc, fd, dec):
    c_in, c_b0, c_b1, c_b2, c_b3, c_b4 = fc[0], fc[3], fc[4], fc[6], fc[8], fc[11]
    d_in, d_b0, d_b1, d_b2, d_b3, d_b4 = fd
    # inconv is a 1x1 conv with padding=1: pad spatially, then 1x1 conv + bias.
    x0 = jnp.pad(_cat(c_b4, d_b4), ((0, 0), (1, 1), (1, 1), (0, 0)))
    x_d0 = conv1x1(x0, dec["inconv"])
    x_d1 = upsample_block(x_d0, _cat(c_b3, d_b3), dec["up1"])
    x_d2 = upsample_block(x_d1, _cat(c_b2, d_b2), dec["up2"])
    x_d3 = upsample_block(x_d2, _cat(c_b1, d_b1), dec["up3"])
    x_d4 = upsample_block(x_d3, _cat(c_b0, d_b0), dec["up4"])
    x_d5 = upsample_block(x_d4, _cat(c_in, d_in), dec["up5"])
    return conv3x3(x_d5, dec["outconv"])


def model_forward(x_nchw, params):
    x = jnp.transpose(x_nchw.astype(jnp.float32), (0, 2, 3, 1))   # -> NHWC
    color = x[..., :3]
    depth = x[..., 3:4]
    fc = densenet_features(color, params["encoder"])
    fd = encoder_depth_forward(depth, params["encoder_depth"])
    out = decoder_forward(fc, fd, params["decoder"])               # (N,H,W,1)
    return jnp.transpose(out, (0, 3, 1, 2)).astype(jnp.float32)    # -> NCHW


if __name__ == "__main__":
    params = init_params(seed=0)

    # 4-channel NCHW input (3 color + 1 depth); 32x32 so the 1/32 stage of the
    # DenseNet encoder is still >= 1x1.
    key = jax.random.PRNGKey(0)
    x = jax.random.normal(key, (2, 4, 32, 32), jnp.float32)

    out = model_forward(x, params)
    out = jax.block_until_ready(out)

    assert out.shape == (2, 1, 32, 32), out.shape
    assert out.dtype == jnp.float32
    assert bool(jnp.all(jnp.isfinite(out)))

    print("KERNEL_OK")
</pallas_src>

<mosaic_0001>
module attributes {stable_mosaic.version = 11 : i64} {
  func.func @_mm_kernel(%arg0: i32, %arg1: i32, %arg2: i32, %arg3: memref<128x128xbf16, #tpu.memory_space<vmem>>, %arg4: memref<128x128xbf16, #tpu.memory_space<vmem>>, %arg5: memref<1x128xf32, #tpu.memory_space<vmem>>, %arg6: memref<1x128xf32, #tpu.memory_space<vmem>>, %arg7: memref<1x128xf32, #tpu.memory_space<vmem>>, %arg8: memref<1x128xf32, #tpu.memory_space<vmem>>, %arg9: memref<128x128xbf16, #tpu.memory_space<vmem>>, %arg10: memref<128x128xf32, #tpu.memory_space<vmem>>) attributes {dimension_semantics = [#tpu.dimension_semantics<parallel>, #tpu.dimension_semantics<parallel>, #tpu.dimension_semantics<arbitrary>], iteration_bounds = array<i64: 4, 1, 2>, scalar_prefetch = 0 : i64, scratch_operands = 1 : i64, tpu.core_type = #tpu.core_type<tc>, window_params = [{transform_indices = @transform_0, window_bounds = array<i64: 128, 128>}, {transform_indices = @transform_1, window_bounds = array<i64: 128, 128>}, {transform_indices = @transform_2, window_bounds = array<i64: 1, 128>}, {transform_indices = @transform_3, window_bounds = array<i64: 1, 128>}, {transform_indices = @transform_4, window_bounds = array<i64: 1, 128>}, {transform_indices = @transform_5, window_bounds = array<i64: 1, 128>}, {transform_indices = @transform_6, window_bounds = array<i64: 128, 128>}]} {
    %c0_i32 = arith.constant 0 : i32
    %0 = arith.cmpi eq, %arg2, %c0_i32 : i32
    %1 = arith.extui %0 : i1 to i32
    %c0_i32_0 = arith.constant 0 : i32
    %2 = arith.cmpi ne, %1, %c0_i32_0 : i32
    scf.if %2 {
      %cst_9 = arith.constant 0.000000e+00 : f32
      %12 = vector.broadcast %cst_9 : f32 to vector<128x128xf32>
      %c0_10 = arith.constant 0 : index
      %c0_11 = arith.constant 0 : index
      %13 = vector.load %arg10[%c0_10, %c0_11] : memref<128x128xf32, #tpu.memory_space<vmem>>, vector<128x128xf32>
      tpu.vector_store %arg10[%c0_10, %c0_11], %12 {strides = array<i32>} : memref<128x128xf32, #tpu.memory_space<vmem>>, vector<128x128xf32>,
    } else {
    }
    %c0 = arith.constant 0 : index
    %c0_1 = arith.constant 0 : index
    %3 = vector.load %arg3[%c0, %c0_1] : memref<128x128xbf16, #tpu.memory_space<vmem>>, vector<128x128xbf16>
    %c0_2 = arith.constant 0 : index
    %c0_3 = arith.constant 0 : index
    %4 = vector.load %arg10[%c0_2, %c0_3] : memref<128x128xf32, #tpu.memory_space<vmem>>, vector<128x128xf32>
    %c0_4 = arith.constant 0 : index
    %c0_5 = arith.constant 0 : index
    %5 = vector.load %arg4[%c0_4, %c0_5] : memref<128x128xbf16, #tpu.memory_space<vmem>>, vector<128x128xbf16>
    %cst = arith.constant dense<0.000000e+00> : vector<128x128xf32>
    %6 = tpu.matmul %3, %5, %cst {dimension_numbers = #tpu.dot_dimension_numbers<[1], [0], [0], [1], [0, 0, 1, 1], [], []>} : vector<128x128xbf16>, vector<128x128xbf16>, vector<128x128xf32> -> vector<128x128xf32>
    %7 = arith.addf %4, %6 : vector<128x128xf32>
    %c0_6 = arith.constant 0 : index
    %c0_7 = arith.constant 0 : index
    %8 = vector.load %arg10[%c0_6, %c0_7] : memref<128x128xf32, #tpu.memory_space<vmem>>, vector<128x128xf32>
    tpu.vector_store %arg10[%c0_6, %c0_7], %7 {strides = array<i32>} : memref<128x128xf32, #tpu.memory_space<vmem>>, vector<128x128xf32>,
    %c1_i32 = arith.constant 1 : i32
    %9 = arith.cmpi eq, %arg2, %c1_i32 : i32
    %10 = arith.extui %9 : i1 to i32
    %c0_i32_8 = arith.constant 0 : i32
    %11 = arith.cmpi ne, %10, %c0_i32_8 : i32
    scf.if %11 {
      %c0_9 = arith.constant 0 : index
      %c0_10 = arith.constant 0 : index
      %12 = vector.load %arg10[%c0_9, %c0_10] : memref<128x128xf32, #tpu.memory_space<vmem>>, vector<128x128xf32>
      %c0_11 = arith.constant 0 : index
      %c0_12 = arith.constant 0 : index
      %13 = vector.load %arg7[%c0_11, %c0_12] : memref<1x128xf32, #tpu.memory_space<vmem>>, vector<1x128xf32>
      %c0_13 = arith.constant 0 : index
      %c0_14 = arith.constant 0 : index
      %14 = vector.load %arg8[%c0_13, %c0_14] : memref<1x128xf32, #tpu.memory_space<vmem>>, vector<1x128xf32>
      %15 = vector.broadcast %13 : vector<1x128xf32> to vector<128x128xf32>
      %16 = arith.mulf %12, %15 : vector<128x128xf32>
      %17 = vector.broadcast %14 : vector<1x128xf32> to vector<128x128xf32>
      %18 = arith.addf %16, %17 : vector<128x128xf32>
      %cst_15 = arith.constant 0.000000e+00 : f32
      %19 = vector.broadcast %cst_15 : f32 to vector<128x128xf32>
      %20 = arith.maximumf %18, %19 : vector<128x128xf32>
      %21 = arith.truncf %20 : vector<128x128xf32> to vector<128x128xbf16>
      %c0_16 = arith.constant 0 : index
      %c0_17 = arith.constant 0 : index
      %22 = vector.load %arg9[%c0_16, %c0_17] : memref<128x128xbf16, #tpu.memory_space<vmem>>, vector<128x128xbf16>
      tpu.vector_store %arg9[%c0_16, %c0_17], %21 {strides = array<i32>} : memref<128x128xbf16, #tpu.memory_space<vmem>>, vector<128x128xbf16>,
    } else {
    }
    return
  }
  func.func @transform_0(%arg0: i32, %arg1: i32, %arg2: i32) -> (i32, i32) {
    %c0_i32 = arith.constant 0 : i32
    return %arg0, %arg2 : i32, i32
  }
  func.func @transform_1(%arg0: i32, %arg1: i32, %arg2: i32) -> (i32, i32) {
    %c0_i32 = arith.constant 0 : i32
    return %arg2, %arg1 : i32, i32
  }
  func.func @transform_2(%arg0: i32, %arg1: i32, %arg2: i32) -> (i32, i32) {
    %c0_i32 = arith.constant 0 : i32
    %c0_i32_0 = arith.constant 0 : i32
    return %c0_i32, %arg2 : i32, i32
  }
  func.func @transform_3(%arg0: i32, %arg1: i32, %arg2: i32) -> (i32, i32) {
    %c0_i32 = arith.constant 0 : i32
    %c0_i32_0 = arith.constant 0 : i32
    return %c0_i32, %arg2 : i32, i32
  }
  func.func @transform_4(%arg0: i32, %arg1: i32, %arg2: i32) -> (i32, i32) {
    %c0_i32 = arith.constant 0 : i32
    %c0_i32_0 = arith.constant 0 : i32
    return %c0_i32, %arg1 : i32, i32
  }
  func.func @transform_5(%arg0: i32, %arg1: i32, %arg2: i32) -> (i32, i32) {
    %c0_i32 = arith.constant 0 : i32
    %c0_i32_0 = arith.constant 0 : i32
    return %c0_i32, %arg1 : i32, i32
  }
  func.func @transform_6(%arg0: i32, %arg1: i32, %arg2: i32) -> (i32, i32) {
    %c0_i32 = arith.constant 0 : i32
    return %arg0, %arg1 : i32, i32
  }
}

</mosaic_0001>

<bundles_post_ra>
// kernel: _mm_call.1
= control target key start
LH: loop header
LB: loop body
LE: loop exit
PB: predicated region body
PF: predicated region fallthrough
CT: control target
= control target key end

     0   :  { %s2043_s0 = inlined_call_operand.hbm [shape: bf16[512,256], index: 0, kind: input, shape index: {}]   ;;  %s2044_s1 = inlined_call_operand.hbm [shape: bf16[256,128], index: 1, kind: input, shape index: {}]   ;;  %s2045_s2 = inlined_call_operand.vmem [shape: f32[1,256], index: 2, kind: input, shape index: {}]   ;;  %s2046_s3 = inlined_call_operand.vmem [shape: f32[1,256], index: 3, kind: input, shape index: {}]   ;;  %s2047_s4 = inlined_call_operand.vmem [shape: f32[1,128], index: 4, kind: input, shape index: {}]   ;;  %s2048_s5 = inlined_call_operand.vmem [shape: f32[1,128], index: 5, kind: input, shape index: {}]   ;;  %s2049_s6 = inlined_call_operand.hbm [shape: bf16[512,128], index: 6, kind: output, shape index: {}]  }
   0x1   :  { %2061 = sst [smem:[#allocation17_spill]] %s2043_s0 }
   0x2   :  { %2062 = sst [smem:[#allocation18_spill]] %s2044_s1 }
   0x3   :  { %2063 = sst [smem:[#allocation19_spill]] %s2047_s4 }
   0x4   :  { %2064 = sst [smem:[#allocation20_spill]] %s2048_s5 }
   0x5   :  { %2065 = sst [smem:[#allocation21_spill]] %s2049_s6 }
   0x6   :  { %11 = vsyncpa [#allocation4], 0 }
   0x7   :  { %13 = vsyncpa [#allocation4 + $0x1], 0 }
   0x8   :  { %14 = vsyncpa [#allocation7], 0 }
   0x9   :  { %16 = vsyncpa [#allocation7 + $0x1], 0 }
   0xa   :  { %17 = vsyncpa [#allocation5], 0 }
   0xb   :  { %19 = vsyncpa [#allocation5 + $0x1], 0  ;;  %s1623_s21 = smov 0   ;;  %s1625_s2 = smov 0  }
   0xc   :  { %s1627_s3 = smov 0   ;;  %s1629_s22 = smov 0  }
   0xd   :  { %s1631_s23 = smov 0   ;;  %s1633_s24 = smov 0  }
   0xe   :  { %s1635_s25 = smov 0   ;;  %s1637_s26 = smov 0  }
   0xf   :  { %s1639_s27 = smov 0   ;;  %s1641_s28 = smov 0  }
  0x10   :  { %s1643_s29 = smov 0   ;;  %s1645_s30 = smov 0  }
  0x11   :  { %s1647_s7 = smov 0   ;;  %s1649_s8 = smov 0  }
  0x12 LB: > { %2066 = sst [smem:[#allocation12_spill]] %s1525_s21  ;;  %s37_s9 = sadd.s32 1, %s1569_s30  ;;  %s1577_s8 = sphi %s1649_s8, %s25_s8   ;;  %s1573_s7 = sphi %s1647_s7, %s2114_s7   ;;  %s1569_s30 = sphi %s1645_s30, %s2113_s30   ;;  %s1565_s29 = sphi %s1643_s29, %s2112_s29   ;;  %s1561_s28 = sphi %s1641_s28, %s2111_s28   ;;  %s1557_s27 = sphi %s1639_s27, %s2110_s27   ;;  %s1553_s26 = sphi %s1637_s26, %s2109_s26   ;;  %s1549_s25 = sphi %s1635_s25, %s2108_s25   ;;  %s1545_s24 = sphi %s1633_s24, %s2107_s24   ;;  %s1541_s23 = sphi %s1631_s23, %s2106_s23   ;;  %s1537_s22 = sphi %s1629_s22, %s2105_s22   ;;  %s1533_s3 = sphi %s1627_s3, %s2104_s3   ;;  %s1529_s2 = sphi %s1625_s2, %s2103_s2   ;;  %s1525_s21 = sphi %s1623_s21, %s2102_s21  }
  0x13   : > { %2067 = sst [smem:[#allocation13_spill]] %s1561_s28  ;;  %s44_s10 = sadd.s32 1, %s1573_s7 }
  0x14   : > { %2068 = sst [smem:[#allocation14_spill]] %s1565_s29  ;;  %p38_p0 = scmp.ge.s32.totalorder %s37_s9, 2 }
  0x15   : > { %s53_s11 = sadd.s32 1, %s1557_s27  ;;  %p60_p1 = scmp.ne.s32.totalorder %s1557_s27, %s1553_s26 }
  0x16   : > { %p2054_p2 = scmp.eq.s32.totalorder %s1577_s8, 0  ;;  %s2116_s9 = smov (%p38_p0, %s37_s9), 0 }
  0x17   : > { %2069 = sst [smem:[#allocation15_spill]] %s2116_s9  ;;  %s2118_s10 = smov (!%p38_p0, %s44_s10), %s1573_s7 }
  0x18   : > { %s1704_s12 = ssub.s32 %s1569_s30, %s2116_s9  ;;  %p1708_p3 = por %p2054_p2, %p60_p1 }
  0x19   : > { %p46_p4 = scmp.ge.s32.totalorder %s2118_s10, 4  ;;  %s213_s14 = sadd.s32 1, %s1533_s3 }
  0x1a   : > { %p2053_p7 = scmp.lt.s32.totalorder %s1577_s8, 8  ;;  %s262_s16 = sand.u32 1, %s1557_s27  }
  0x1b   : > { %s2120_s10 = smov (%p46_p4, %s2118_s10), 0  ;;  %s1032_s20 = sshll.u32 %s262_s16, 6 }
  0x1c   : > { %2071 = sst [smem:[#allocation16_spill]] %s2120_s10  ;;  %s48_s15 = ssub.s32 %s1573_s7, %s2120_s10 }
  0x1d   : > { %s50_s17 = sor.u32 %s1704_s12, %s48_s15  ;;  %p211_p8 = scmp.eq.s32.totalorder %s48_s15, 0 }
  0x1e   : > { %p51_p9 = scmp.eq.s32.totalorder %s50_s17, 0  ;;  %s1084_s9 = sshll.u32 %s1573_s7, 5 }
  0x1f   : > { %s1724_s18 = scalar_select %p211_p8, %s1533_s3, %s213_s14  }
  0x20   : > { %s1727_s19 = scalar_select %p51_p9, %s1557_s27, %s53_s11  }
  0x21   : > { %s272_s6 = sadd.s32 %s1569_s30, %s1084_s9  ;;  %s266_s5 = scalar_lea.vmem [#allocation3], %s1032_s20 }
  0x22   : > { %s1035_s29 = sshll.u32 %s272_s6, 6  ;;  %s275_s4 = sshll.u32 %s266_s5, 4  ;;  %s1736_s4 = int_to_ptr.vmem [resolvable:$true] %s275_s4 }
  0x23   : > { %s2072_s0 = sld [smem:[#allocation17_spill]]  ;;  %p1742_p10 = pnand %p2053_p7, %p1708_p3 }
  0x24   : > { %p1039_p11 = scmp.ge.s32.totalorder %s1577_s8, 1  ;;  %s1747_s5 = scalar_lea.sflag [#allocation4], %s262_s16 }
  0x25   : > { %p1369_p13 = pneg %p1742_p10 }
  0x29   : > { %s1734_s21 = scalar_lea.hbm %s2072_s0, %s1035_s29  ;;  %s1372_s29 = scalar_lea.hbm %s2072_s0, 8192 }
  0x2a   : > { %s1367_s1 = scalar_lea.hbm %s1734_s21, 1024  ;;  %p1373_p3 = scmp.lt.u32.totalorder %s1734_s21, %s2072_s0 }
  0x2b   : > { %p1368_p12 = scmp.ne.s32.totalorder %s1734_s21, %s1367_s1  ;;  %p1374_p4 = scmp.lt.u32.totalorder %s1372_s29, %s1367_s1 }
  0x2c   : > { %p1376_p9 = scmp.lt.u32.totalorder %s1367_s1, %s1734_s21 }
  0x2d   : > { %p1370_p0 = pnand %p1369_p13, %p1368_p12  ;;  %p1375_p8 = por %p1374_p4, %p1373_p3 }
  0x2f   : > { %p1371_p1 = pneg %p1370_p0  ;;  %p1377_p7 = por %p1376_p9, %p1375_p8 }
  0x31   : > { %p1378_p2 = pnand %p1377_p7, %p1371_p1 }
  0x33   : > { %1381 = shalt.err (!%p1378_p2)
}
  0x34   : > { %s1382_s14 = scalar_lea.vmem %s1736_s4, 1024  ;;  %s1579_s15 = smov [#allocation3]  }
  0x35   : > { %p1383_p12 = scmp.ne.s32.totalorder %s1736_s4, %s1382_s14  ;;  %s1387_s16 = sshll.u32 %s1579_s15, 4  ;;  %s1388_s16 = int_to_ptr.vmem [resolvable:$false] %s1387_s16 }
  0x36   : > { %s1389_s17 = scalar_lea.vmem %s1388_s16, 2048  ;;  %p1390_p6 = scmp.lt.s32.totalorder %s1736_s4, %s1388_s16 }
  0x37   : > { %p1385_p0 = pnand %p1383_p12, %p1369_p13  ;;  %p1391_p3 = scmp.lt.s32.totalorder %s1389_s17, %s1382_s14 }
  0x39   : > { %p1386_p5 = pneg %p1385_p0  ;;  %p1392_p4 = por %p1391_p3, %p1390_p6 }
  0x3b   : > { %p1393_p8 = pnand %p1392_p4, %p1386_p5 }
  0x3d   : > { %1396 = shalt.err (!%p1393_p8)
}
  0x3e   : > { %s1580_s20 = smov 128   ;;  %s2055_s1 = smov 64  }
  0x3f   : > { %s2056_s6 = smov 4   ;;  %s2074_s28 = sld [smem:[#allocation12_spill]] }
  0x40   : > { %1223 = dma.hbm_to_vmem [thread:$0]  (!%p1742_p10), %s1734_s21, 1024, %s1736_s4, %s1747_s5, %s1580_s20, %s2055_s1, %s2056_s6  }
  0x41   : > { %p317_p2 = scmp.lt.s32.totalorder %s1577_s8, 9  ;;  %s1026_s9 = sadd.s32 4294967295, %s1577_s8  }
  0x42   : > { %s1027_s13 = sadd.s32 4294967294, %s1577_s8   ;;  %p67_p6 = scmp.eq.s32.totalorder %s1026_s9, 0 }
  0x43   : > { %p1780_p5 = pnand %p1039_p11, %p317_p2  ;;  %s81_s14 = sadd.s32 1, %s1545_s24 }
  0x44   : > { %p2076_p7 = scmp.eq.s32.totalorder %s1704_s12, 0  ;;  %p2077_p13 = scmp.ne.s32.totalorder %s1553_s26, %s1549_s25 }
  0x45   : > { %p88_p10 = scmp.ne.s32.totalorder %s1545_s24, %s1541_s23  ;;  %p94_p11 = scmp.ne.s32.totalorder %s1541_s23, %s1537_s22 }
  0x46   : > { %s1790_s15 = scalar_select %p2076_p7, %s1545_s24, %s81_s14  }
  0x47   : > { %p1795_p1 = por %p67_p6, %p2077_p13  ;;  %p223_p9 = scmp.ne.s32.totalorder %s1533_s3, %s1529_s2 }
  0x48   : > { %p2079_p12 = scmp.eq.s32.totalorder %s1577_s8, 0  ;;  %p224_p3 = scmp.eq.s32.totalorder %s1026_s9, 7 }
  0x49   : > { %s2078_s11 = scalar_select %p1795_p1, 1, 0 }
  0x4a   : > { %p90_p0 = por %p88_p10, %p2079_p12  ;;  %p1807_p4 = por %p94_p11, %p67_p6 }
  0x4b   : > { %p229_p8 = scmp.ne.s32.totalorder %s1529_s2, %s2074_s28  ;;  %p1813_p2 = por %p224_p3, %p223_p9 }
  0x4c   : > { %s2080_s4 = scalar_select %p1807_p4, 1, 0 }
  0x4d   : > { %s2081_s21 = scalar_select %p1813_p2, 1, 0 }
  0x4e   : > { %p230_p7 = scmp.eq.s32.totalorder %s1027_s13, 7  ;;  %s285_s25 = sand.u32 1, %s1545_s24  }
  0x4f   : > { %s1085_s12 = sshll.u32 %s1569_s30, 10  ;;  %s1036_s22 = sshll.u32 %s285_s25, 6 }
  0x50   : > { %p1819_p13 = por %p230_p7, %p229_p8  ;;  %s2083_s20 = sld [smem:[#allocation18_spill]] }
  0x51   : > { %p2084_p6 = scmp.lt.s32.totalorder %s1577_s8, 8  ;;  %s289_s13 = scalar_lea.vmem [#allocation6], %s1036_s22 }
  0x52   : > { %s2082_s5 = scalar_select %p1819_p13, 1, 0 }
  0x53   : > { %p1830_p10 = pnand %p2084_p6, %p90_p0  ;;  %s297_s14 = sshll.u32 %s289_s13, 4  ;;  %s1834_s14 = int_to_ptr.vmem [resolvable:$true] %s297_s14 }
  0x54   : > { %s1836_s1 = scalar_lea.sflag [#allocation7], %s285_s25 }
  0x55   : > { %p1399_p9 = pneg %p1830_p10 }
  0x56   : > { %s1826_s9 = scalar_lea.hbm %s2083_s20, %s1085_s12  ;;  %s1402_s6 = scalar_lea.hbm %s2083_s20, 2048 }
  0x57   : > { %s1397_s16 = scalar_lea.hbm %s1826_s9, 1024  ;;  %p1403_p0 = scmp.lt.u32.totalorder %s1826_s9, %s2083_s20 }
  0x58   : > { %p1398_p11 = scmp.ne.s32.totalorder %s1826_s9, %s1397_s16  ;;  %p1404_p8 = scmp.lt.u32.totalorder %s1402_s6, %s1397_s16 }
  0x59   : > { %p1406_p6 = scmp.lt.u32.totalorder %s1397_s16, %s1826_s9 }
  0x5a   : > { %p1400_p12 = pnand %p1399_p9, %p1398_p11  ;;  %p1405_p7 = por %p1404_p8, %p1403_p0 }
  0x5c   : > { %p1401_p3 = pneg %p1400_p12  ;;  %p1407_p13 = por %p1406_p6, %p1405_p7 }
  0x5e   : > { %p1408_p2 = pnand %p1407_p13, %p1401_p3 }
  0x60   : > { %1411 = shalt.err (!%p1408_p2)
}
  0x61   : > { %s1412_s25 = scalar_lea.vmem %s1834_s14, 1024  ;;  %s1583_s22 = smov [#allocation6]  }
  0x62   : > { %p1413_p11 = scmp.ne.s32.totalorder %s1834_s14, %s1412_s25  ;;  %s1417_s13 = sshll.u32 %s1583_s22, 4  ;;  %s1418_s13 = int_to_ptr.vmem [resolvable:$false] %s1417_s13 }
  0x63   : > { %s1419_s0 = scalar_lea.vmem %s1418_s13, 2048  ;;  %p1420_p1 = scmp.lt.s32.totalorder %s1834_s14, %s1418_s13 }
  0x64   : > { %p1415_p12 = pnand %p1413_p11, %p1399_p9  ;;  %p1421_p0 = scmp.lt.s32.totalorder %s1419_s0, %s1412_s25 }
  0x66   : > { %p1416_p4 = pneg %p1415_p12  ;;  %p1422_p8 = por %p1421_p0, %p1420_p1 }
  0x68   : > { %p1423_p7 = pnand %p1422_p8, %p1416_p4 }
  0x6a   : > { %1426 = shalt.err (!%p1423_p7)
}
  0x6b   : > { %s2086_s10 = smov 4   ;;  %s2087_s6 = smov 64  }
  0x6c   : > { %1226 = dma.hbm_to_vmem [thread:$0]  (!%p1830_p10), %s1826_s9, 1024, %s1834_s14, %s1836_s1, %s2087_s6, %s2087_s6, %s2086_s10  }
  0x6d   : > { %321 = sbr.rel (%p1780_p5) target bundleno = 441 (0x1b9), region = 44  ;;  %s323_s16 = sand.u32 (!%p1780_p5), 1, %s1553_s26  }
  0x6e   : > { %s1040_s12 = sshll.u32 (!%p1780_p5), %s323_s16, 6  ;;  %s324_s17 = scalar_lea.sflag (!%p1780_p5), [#allocation4], %s323_s16 }
  0x6f   : > { %s1870_s25 = scalar_lea.vmem (!%p1780_p5), [#allocation3], %s1040_s12  ;;  %p2088_p1 = scmp.ne.s32.totalorder (!%p1780_p5), %s2078_s11, 0 }
  0x74   : > { %1512 = dma.done.wait (%p2088_p1), %s324_s17, 1024  }
  0x75   : > { %1514 = vsyncadd (%p2088_p1), %s324_s17, 4294966272  ;;  %s332_s28 = sand.u32 1, %s1541_s23   ;;  %p2089_p5 = scmp.ne.s32.totalorder %s2080_s4, 0 }
  0x76   : > { %s1041_s22 = sshll.u32 %s332_s28, 6  ;;  %s333_s1 = scalar_lea.sflag [#allocation7], %s332_s28 }
  0x77   : > { %s1877_s9 = scalar_lea.vmem [#allocation6], %s1041_s22 }
  0x78   : > { %1516 = dma.done.wait (%p2089_p5), %s333_s1, 1024  }
  0x79   : > { %1518 = vsyncadd (%p2089_p5), %s333_s1, 4294966272  ;;  %s379_s29 = sand.u32 1, %s1529_s2   ;;  %s2090_s11 = sld [smem:[#allocation13_spill]] }
  0x7a   : > { %s1042_s14 = sshll.u32 %s379_s29, 6 }
  0x7b   : > { %s1886_s13 = scalar_lea.vmem [#allocation8], %s1042_s14 }
  0x7f   : > { %p1043_p4 = scmp.ne.s32.totalorder %s2090_s11, 0 }
  0x80   : > { %v1584_v0 = vmov (!%p1043_p4), 0.0  }
  0x81   : > { %401 = sbr.rel (%p1043_p4) target bundleno = 137 (0x89), region = 56  ;;  %402 = vst [vmem:[#allocation2] sm:$0xff] (!%p1043_p4), %v1584_v0  ;;  %403 = vst [vmem:[#allocation2 + $0x8] sm:$0xff] (!%p1043_p4), %v1584_v0 }
  0x82   : > { %404 = vst [vmem:[#allocation2 + $0x10] sm:$0xff] (!%p1043_p4), %v1584_v0  ;;  %405 = vst [vmem:[#allocation2 + $0x18] sm:$0xff] (!%p1043_p4), %v1584_v0 }
  0x83   : > { %406 = vst [vmem:[#allocation2 + $0x20] sm:$0xff] (!%p1043_p4), %v1584_v0  ;;  %407 = vst [vmem:[#allocation2 + $0x28] sm:$0xff] (!%p1043_p4), %v1584_v0 }
  0x84   : > { %408 = vst [vmem:[#allocation2 + $0x30] sm:$0xff] (!%p1043_p4), %v1584_v0  ;;  %409 = vst [vmem:[#allocation2 + $0x38] sm:$0xff] (!%p1043_p4), %v1584_v0 }
  0x85   : > { %410 = vst [vmem:[#allocation2 + $0x40] sm:$0xff] (!%p1043_p4), %v1584_v0  ;;  %411 = vst [vmem:[#allocation2 + $0x48] sm:$0xff] (!%p1043_p4), %v1584_v0 }
  0x86   : > { %412 = vst [vmem:[#allocation2 + $0x50] sm:$0xff] (!%p1043_p4), %v1584_v0  ;;  %413 = vst [vmem:[#allocation2 + $0x58] sm:$0xff] (!%p1043_p4), %v1584_v0 }
  0x87   : > { %414 = vst [vmem:[#allocation2 + $0x60] sm:$0xff] (!%p1043_p4), %v1584_v0  ;;  %415 = vst [vmem:[#allocation2 + $0x68] sm:$0xff] (!%p1043_p4), %v1584_v0 }
  0x88   : > { %416 = vst [vmem:[#allocation2 + $0x70] sm:$0xff] %v1584_v0  ;;  %417 = vst [vmem:[#allocation2 + $0x78] sm:$0xff] %v1584_v0 }
  0x89 PF: > { %v1351_v1 = vld [vmem:[%s1877_s9] sm:$0xff]   ;;  %v1352_v2 = vld [vmem:[%s1877_s9 + $0x8] sm:$0xff]   ;;  %v1353_v3 = vld [vmem:[%s1877_s9 + $0x10] sm:$0xff]   ;;  %s2091_s4 = sld [smem:[#allocation13_spill]] }
  0x8a   : > { %1166 = vmatprep.subr.bf16.mxu0 %v1351_v1  ;;  %1198 = vmatprep.subr.bf16.mxu1 %v1351_v1  ;;  %v1354_v4 = vld [vmem:[%s1877_s9 + $0x18] sm:$0xff]   ;;  %v1359_v5 = vld [vmem:[%s1870_s25] sm:$0xff]   ;;  %v1356_v8 = vld [vmem:[%s1877_s9 + $0x28] sm:$0xff]  }
  0x8b   : > { %1167 = vmatpush3.bf16.msra.mxu0 %v1351_v1  ;;  %1206 = vmatpush3.bf16.msra.mxu1 %v1351_v1  ;;  %v1360_v6 = vld [vmem:[%s1870_s25 + $0x20] sm:$0xff]   ;;  %v1357_v9 = vld [vmem:[%s1877_s9 + $0x30] sm:$0xff]   ;;  %v1358_v10 = vld [vmem:[%s1877_s9 + $0x38] sm:$0xff]  }
  0x8c   : > { %1168 = vmatprep.subr.bf16.mxu0 %v1352_v2  ;;  %1199 = vmatprep.subr.bf16.mxu1 %v1352_v2  ;;  %v1355_v7 = vld [vmem:[%s1877_s9 + $0x20] sm:$0xff]   ;;  %v1361_v11 = vld [vmem:[%s1870_s25 + $0x8] sm:$0xff]   ;;  %v1363_v13 = vld [vmem:[%s1870_s25 + $0x10] sm:$0xff]  }
  0x8d   : > { %1182 = vmatprep.mubr.bf16.mxu0 %v1359_v5  ;;  %1190 = vmatprep.mubr.bf16.mxu1 %v1360_v6  ;;  %v1362_v12 = vld [vmem:[%s1870_s25 + $0x28] sm:$0xff]   ;;  %v1364_v14 = vld [vmem:[%s1870_s25 + $0x30] sm:$0xff]   ;;  %v1365_v15 = vld [vmem:[%s1870_s25 + $0x18] sm:$0xff]  }
  0x8e   : > { %v1366_v16 = vld [vmem:[%s1870_s25 + $0x38] sm:$0xff]   ;;  %v436_v17 = vld [vmem:[#allocation2 + $0x10] sm:$0xff]  ;;  %v434_v19 = vld [vmem:[#allocation2] sm:$0xff] }
  0x8f   : > { %1169 = vmatpush3.bf16.msra.mxu0 %v1352_v2  ;;  %1207 = vmatpush3.bf16.msra.mxu1 %v1352_v2  ;;  %v444_v18 = vld [vmem:[#allocation2 + $0x50] sm:$0xff]  ;;  %v442_v20 = vld [vmem:[#allocation2 + $0x40] sm:$0xff]  ;;  %v437_v23 = vld [vmem:[#allocation2 + $0x18] sm:$0xff]  ;;  %p1060_p2 = scmp.ne.s32.totalorder %s2091_s4, 1 }
  0x90   : > { %1170 = vmatprep.subr.bf16.mxu0 %v1353_v3  ;;  %1200 = vmatprep.subr.bf16.mxu1 %v1353_v3  ;;  %v445_v24 = vld [vmem:[#allocation2 + $0x58] sm:$0xff]  ;;  %v435_v29 = vld [vmem:[#allocation2 + $0x8] sm:$0xff]  ;;  %v440_v41 = vld [vmem:[#allocation2 + $0x30] sm:$0xff]  ;;  %s2092_s6 = sld [smem:[#allocation19_spill]] (!%p1060_p2)  ;;  %s2093_s17 = sld [smem:[#allocation20_spill]] (!%p1060_p2) }
  0x91   : > { %v443_v30 = vld [vmem:[#allocation2 + $0x48] sm:$0xff]  ;;  %v448_v42 = vld [vmem:[#allocation2 + $0x70] sm:$0xff]  ;;  %v438_v43 = vld [vmem:[#allocation2 + $0x20] sm:$0xff] }
  0x92   : > { %v446_v44 = vld [vmem:[#allocation2 + $0x60] sm:$0xff]  ;;  %v441_v47 = vld [vmem:[#allocation2 + $0x38] sm:$0xff]  ;;  %v439_v53 = vld [vmem:[#allocation2 + $0x28] sm:$0xff] }
  0x93   : > { %1171 = vmatpush3.bf16.msra.mxu0 %v1353_v3  ;;  %1208 = vmatpush3.bf16.msra.mxu1 %v1353_v3  ;;  %v449_v48 = vld [vmem:[#allocation2 + $0x78] sm:$0xff]  ;;  %v447_v54 = vld [vmem:[#allocation2 + $0x68] sm:$0xff] }
  0x94   : > { %1172 = vmatprep.subr.bf16.mxu0 %v1354_v4  ;;  %1201 = vmatprep.subr.bf16.mxu1 %v1354_v4 }
  0x96   : > { %v1909_v3 = vld [vmem:[%s2092_s6] ss:$0 sm:$0xff] (!%p1060_p2) }
  0x97   : > { %1173 = vmatpush3.bf16.msra.mxu0 %v1354_v4  ;;  %1209 = vmatpush3.bf16.msra.mxu1 %v1354_v4  ;;  %v1914_v4 = vld [vmem:[%s2093_s17] ss:$0 sm:$0xff] (!%p1060_p2) }
  0x98   : > { %1174 = vmatprep.subr.bf16.mxu0 %v1355_v7  ;;  %1202 = vmatprep.subr.bf16.mxu1 %v1355_v7 }
  0x9b   : > { %1175 = vmatpush3.bf16.msra.mxu0 %v1355_v7  ;;  %1210 = vmatpush3.bf16.msra.mxu1 %v1355_v7 }
  0x9c   : > { %1176 = vmatprep.subr.bf16.mxu0 %v1356_v8  ;;  %1203 = vmatprep.subr.bf16.mxu1 %v1356_v8 }
  0x9f   : > { %1177 = vmatpush3.bf16.msra.mxu0 %v1356_v8  ;;  %1211 = vmatpush3.bf16.msra.mxu1 %v1356_v8 }
  0xa0   : > { %1178 = vmatprep.subr.bf16.mxu0 %v1357_v9  ;;  %1204 = vmatprep.subr.bf16.mxu1 %v1357_v9 }
  0xa3   : > { %1179 = vmatpush3.bf16.msra.mxu0 %v1357_v9  ;;  %1212 = vmatpush3.bf16.msra.mxu1 %v1357_v9 }
  0xa4   : > { %1180 = vmatprep.subr.bf16.mxu0 %v1358_v10  ;;  %1205 = vmatprep.subr.bf16.mxu1 %v1358_v10 }
  0xa7   : > { %1181 = vmatpush3.bf16.msra.mxu0 %v1358_v10  ;;  %1213 = vmatpush3.bf16.msra.mxu1 %v1358_v10 }
  0xaa   : > { %1183 = vmatmul.mubr.bf16.vlgmr.msra.gmra.mrb[0].mxu0 %v1361_v11  ;;  %1191 = vmatmul.mubr.bf16.vlgmr.msra.gmra.mrb[0].mxu1 %v1362_v12 }
  0xab   : > { %1186 = vmatprep.mubr.bf16.mxu0 %v1363_v13  ;;  %1194 = vmatprep.mubr.bf16.mxu1 %v1364_v14 }
  0xb2   : > { %1187 = vmatmul.mubr.bf16.gmra.mrb[4].mxu0 %v1365_v15  ;;  %1195 = vmatmul.mubr.bf16.gmra.mrb[4].mxu1 %v1366_v16 }
 0x17d   : > { %v1184_v21 = vpop.f32.mrb[0].mxu0  ;;  %v1192_v22 = vpop.f32.mrb[0].mxu1 }
 0x17e   : > { %v661_v25 = vadd.f32 %v1184_v21, %v436_v17  ;;  %v669_v26 = vadd.f32 %v1192_v22, %v444_v18  ;;  %v596_v27 = vpop.f32.mrb[1].mxu0  ;;  %v628_v28 = vpop.f32.mrb[1].mxu1 }
 0x17f   : > { %v659_v31 = vadd.f32 %v596_v27, %v434_v19  ;;  %v667_v32 = vadd.f32 %v628_v28, %v442_v20  ;;  %v1185_v33 = vpop.f32.mrb[2].mxu0  ;;  %v1193_v34 = vpop.f32.mrb[2].mxu1 }
 0x180   : > { %677 = vst [vmem:[#allocation2 + $0x10] sm:$0xff] %v661_v25  ;;  %685 = vst [vmem:[#allocation2 + $0x50] sm:$0xff] %v669_v26  ;;  %v662_v35 = vadd.f32 %v1185_v33, %v437_v23  ;;  %v670_v36 = vadd.f32 %v1193_v34, %v445_v24  ;;  %v599_v37 = vpop.f32.mrb[3].mxu0  ;;  %v631_v38 = vpop.f32.mrb[3].mxu1 }
 0x181   : > { %675 = vst [vmem:[#allocation2] sm:$0xff] %v659_v31  ;;  %683 = vst [vmem:[#allocation2 + $0x40] sm:$0xff] %v667_v32  ;;  %v660_v39 = vadd.f32 %v599_v37, %v435_v29  ;;  %v668_v40 = vadd.f32 %v631_v38, %v443_v30 }
 0x182   : > { %678 = vst [vmem:[#allocation2 + $0x18] sm:$0xff] %v662_v35  ;;  %686 = vst [vmem:[#allocation2 + $0x58] sm:$0xff] %v670_v36 }
 0x183   : > { %676 = vst [vmem:[#allocation2 + $0x8] sm:$0xff] %v660_v39  ;;  %684 = vst [vmem:[#allocation2 + $0x48] sm:$0xff] %v668_v40 }
 0x185   : > { %v1188_v45 = vpop.f32.mrb[4].mxu0  ;;  %v1196_v46 = vpop.f32.mrb[4].mxu1  ;;  %694 = sbr.rel (%p1060_p2) target bundleno = 413 (0x19d), region = 60 }
 0x186   : > { %v665_v49 = vadd.f32 %v1188_v45, %v440_v41  ;;  %v673_v50 = vadd.f32 %v1196_v46, %v448_v42  ;;  %v612_v51 = vpop.f32.mrb[5].mxu0  ;;  %v644_v52 = vpop.f32.mrb[5].mxu1 }
 0x187   : > { %v663_v55 = vadd.f32 %v612_v51, %v438_v43  ;;  %v671_v56 = vadd.f32 %v644_v52, %v446_v44  ;;  %v1189_v57 = vpop.f32.mrb[6].mxu0  ;;  %v1197_v58 = vpop.f32.mrb[6].mxu1  ;;  %v697_v7 = vld [vmem:[#allocation2 + $0x10] sm:$0xff] (!%p1060_p2) }
 0x188   : > { %681 = vst [vmem:[#allocation2 + $0x30] sm:$0xff] %v665_v49  ;;  %689 = vst [vmem:[#allocation2 + $0x70] sm:$0xff] %v673_v50  ;;  %v666_v59 = vadd.f32 %v1189_v57, %v441_v47  ;;  %v674_v60 = vadd.f32 %v1197_v58, %v449_v48  ;;  %v615_v61 = vpop.f32.mrb[7].mxu0  ;;  %v647_v62 = vpop.f32.mrb[7].mxu1  ;;  %v695_v1 = vld [vmem:[#allocation2] sm:$0xff] (!%p1060_p2)  ;;  %v721_v9 = vmul.f32 (!%p1060_p2), %v1909_v3, %v697_v7  ;;  %v705_v33 = vld [vmem:[#allocation2 + $0x50] sm:$0xff] (!%p1060_p2) }
 0x189   : > { %679 = vst [vmem:[#allocation2 + $0x20] sm:$0xff] %v663_v55  ;;  %687 = vst [vmem:[#allocation2 + $0x60] sm:$0xff] %v671_v56  ;;  %v664_v63 = vadd.f32 %v615_v61, %v439_v53  ;;  %v672_v0 = vadd.f32 %v647_v62, %v447_v54  ;;  %v719_v5 = vmul.f32 (!%p1060_p2), %v1909_v3, %v695_v1  ;;  %v698_v8 = vld [vmem:[#allocation2 + $0x18] sm:$0xff] (!%p1060_p2)  ;;  %v703_v23 = vld [vmem:[#allocation2 + $0x40] sm:$0xff] (!%p1060_p2) }
 0x18a   : > { %682 = vst [vmem:[#allocation2 + $0x38] sm:$0xff] %v666_v59  ;;  %690 = vst [vmem:[#allocation2 + $0x78] sm:$0xff] %v674_v60  ;;  %v696_v2 = vld [vmem:[#allocation2 + $0x8] sm:$0xff] (!%p1060_p2)  ;;  %v722_v10 = vmul.f32 (!%p1060_p2), %v1909_v3, %v698_v8  ;;  %v743_v19 = vadd.f32 (!%p1060_p2), %v1914_v4, %v721_v9  ;;  %v706_v34 = vld [vmem:[#allocation2 + $0x58] sm:$0xff] (!%p1060_p2)  ;;  %v727_v38 = vmul.f32 (!%p1060_p2), %v1909_v3, %v703_v23 }
 0x18b   : > { %680 = vst [vmem:[#allocation2 + $0x28] sm:$0xff] %v664_v63  ;;  %688 = vst [vmem:[#allocation2 + $0x68] sm:$0xff] %v672_v0  ;;  %v720_v6 = vmul.f32 (!%p1060_p2), %v1909_v3, %v696_v2  ;;  %v741_v14 = vadd.f32 (!%p1060_p2), %v1914_v4, %v719_v5  ;;  %v704_v28 = vld [vmem:[#allocation2 + $0x48] sm:$0xff] (!%p1060_p2)  ;;  %v729_v48 = vmul.f32 (!%p1060_p2), %v1909_v3, %v705_v33 }
 0x18c   : > { %v744_v20 = vadd.f32 %v1914_v4, %v722_v10  ;;  %v759_v29 = vmax.f32 %v743_v19, 0.0  ;;  %v728_v44 = vmul.f32 %v1909_v3, %v704_v28  ;;  %v749_v47 = vadd.f32 %v1914_v4, %v727_v38 }
 0x18d   : > { %v742_v15 = vadd.f32 %v1914_v4, %v720_v6  ;;  %v757_v24 = vmax.f32 %v741_v14, 0.0  ;;  %v730_v49 = vmul.f32 %v1909_v3, %v706_v34  ;;  %v751_v56 = vadd.f32 %v1914_v4, %v729_v48 }
 0x18e   : > { %v760_v30 = vmax.f32 %v744_v20, 0.0  ;;  %v750_v52 = vadd.f32 %v1914_v4, %v728_v44  ;;  %v765_v55 = vmax.f32 %v749_v47, 0.0 }
 0x18f   : > { %v701_v13 = vld [vmem:[#allocation2 + $0x30] sm:$0xff]  ;;  %v758_v25 = vmax.f32 %v742_v15, 0.0  ;;  %v752_v57 = vadd.f32 %v1914_v4, %v730_v49  ;;  %v767_v63 = vmax.f32 %v751_v56, 0.0 }
 0x190   : > { %v699_v11 = vld [vmem:[#allocation2 + $0x20] sm:$0xff]  ;;  %v725_v21 = vmul.f32 %v1909_v3, %v701_v13  ;;  %v1111_v41 = vpack.c.bf16 %v760_v30, %v759_v29  ;;  %v709_v45 = vld [vmem:[#allocation2 + $0x70] sm:$0xff]  ;;  %v766_v59 = vmax.f32 %v750_v52, 0.0 }
 0x191   : > { %v723_v16 = vmul.f32 %v1909_v3, %v699_v11  ;;  %v702_v18 = vld [vmem:[#allocation2 + $0x38] sm:$0xff]  ;;  %v1106_v35 = vpack.c.bf16 %v758_v25, %v757_v24  ;;  %v707_v39 = vld [vmem:[#allocation2 + $0x60] sm:$0xff]  ;;  %v733_v58 = vmul.f32 %v1909_v3, %v709_v45  ;;  %v768_v0 = vmax.f32 %v752_v57, 0.0 }
 0x192   : > { %v700_v12 = vld [vmem:[#allocation2 + $0x28] sm:$0xff]  ;;  %v726_v22 = vmul.f32 %v1909_v3, %v702_v18  ;;  %v747_v31 = vadd.f32 %v1914_v4, %v725_v21  ;;  %v710_v50 = vld [vmem:[#allocation2 + $0x78] sm:$0xff]  ;;  %1143 = vst [vmem:[%s1886_s13 + $0x8] sm:$0xff] %v1111_v41   ;;  %v731_v53 = vmul.f32 %v1909_v3, %v707_v39  ;;  %v1126_v2 = vpack.c.bf16 %v766_v59, %v765_v55 }
 0x193   : > { %v724_v17 = vmul.f32 %v1909_v3, %v700_v12  ;;  %v745_v26 = vadd.f32 %v1914_v4, %v723_v16  ;;  %v708_v40 = vld [vmem:[#allocation2 + $0x68] sm:$0xff]  ;;  %1107 = vst [vmem:[%s1886_s13] sm:$0xff] %v1106_v35   ;;  %v734_v62 = vmul.f32 %v1909_v3, %v710_v50  ;;  %v755_v1 = vadd.f32 %v1914_v4, %v733_v58 }
 0x194   : > { %v748_v32 = vadd.f32 %v1914_v4, %v726_v22  ;;  %v763_v42 = vmax.f32 %v747_v31, 0.0  ;;  %v732_v54 = vmul.f32 %v1909_v3, %v708_v40  ;;  %v753_v60 = vadd.f32 %v1914_v4, %v731_v53  ;;  %1146 = vst [vmem:[%s1886_s13 + $0x20] sm:$0xff] %v1126_v2  }
 0x195   : > { %v746_v27 = vadd.f32 %v1914_v4, %v724_v17  ;;  %v761_v36 = vmax.f32 %v745_v26, 0.0  ;;  %v756_v7 = vadd.f32 %v1914_v4, %v734_v62  ;;  %v1131_v8 = vpack.c.bf16 %v768_v0, %v767_v63 }
 0x196   : > { %v764_v43 = vmax.f32 %v748_v32, 0.0  ;;  %v754_v61 = vadd.f32 %v1914_v4, %v732_v54  ;;  %v769_v5 = vmax.f32 %v753_v60, 0.0  ;;  %v771_v9 = vmax.f32 %v755_v1, 0.0 }
 0x197   : > { %v762_v37 = vmax.f32 %v746_v27, 0.0  ;;  %v772_v11 = vmax.f32 %v756_v7, 0.0  ;;  %1147 = vst [vmem:[%s1886_s13 + $0x28] sm:$0xff] %v1131_v8  }
 0x198   : > { %v1121_v51 = vpack.c.bf16 %v764_v43, %v763_v42  ;;  %v770_v6 = vmax.f32 %v754_v61, 0.0 }
 0x199   : > { %v1116_v46 = vpack.c.bf16 %v762_v37, %v761_v36  ;;  %v1141_v12 = vpack.c.bf16 %v772_v11, %v771_v9 }
 0x19a   : > { %1145 = vst [vmem:[%s1886_s13 + $0x18] sm:$0xff] %v1121_v51   ;;  %v1136_v10 = vpack.c.bf16 %v770_v6, %v769_v5 }
 0x19b   : > { %1144 = vst [vmem:[%s1886_s13 + $0x10] sm:$0xff] %v1116_v46   ;;  %1149 = vst [vmem:[%s1886_s13 + $0x38] sm:$0xff] %v1141_v12  }
 0x19c   : > { %1148 = vst [vmem:[%s1886_s13 + $0x30] sm:$0xff] %v1136_v10  }
 0x19d PF: > { %s2094_s25 = sld [smem:[#allocation14_spill]]  ;;  %s2095_s9 = sld [smem:[#allocation21_spill]] }
 0x19e   : > { %s868_s11 = sshll.u32 %s1886_s13, 4  ;;  %s1967_s4 = scalar_lea.sflag [#allocation5], %s379_s29  ;;  %s1963_s11 = int_to_ptr.vmem [resolvable:$true] %s868_s11 }
 0x19f   : > { %s1427_s0 = scalar_lea.vmem %s1963_s11, 1024  ;;  %p2096_p10 = scmp.ne.s32.totalorder %s2081_s21, 0 }
 0x1a0   : > { %p1428_p13 = scmp.ne.s32.totalorder %s1963_s11, %s1427_s0  ;;  %s1585_s10 = smov [#allocation8]  }
 0x1a1   : > { %s1431_s6 = sshll.u32 %s1585_s10, 4  ;;  %s1432_s6 = int_to_ptr.vmem [resolvable:$false] %s1431_s6 }
 0x1a2   : > { %p1429_p9 = pnand %p1428_p13, %p2096_p10  ;;  %s1433_s16 = scalar_lea.vmem %s1432_s6, 2048 }
 0x1a3   : > { %s1102_s28 = sshll.u32 %s2094_s25, 10  ;;  %p1434_p6 = scmp.lt.s32.totalorder %s1963_s11, %s1432_s6 }
 0x1a4   : > { %s1960_s14 = scalar_lea.hbm %s2095_s9, %s1102_s28  ;;  %p1430_p3 = pneg %p1429_p9 }
 0x1a5   : > { %p1435_p11 = scmp.lt.s32.totalorder %s1433_s16, %s1427_s0 }
 0x1a7   : > { %p1436_p12 = por %p1435_p11, %p1434_p6 }
 0x1a9   : > { %p1437_p0 = pnand %p1436_p12, %p1430_p3 }
 0x1ab   : > { %1440 = shalt.err (!%p1437_p0)
}
 0x1ac   : > { %s1441_s29 = scalar_lea.hbm %s1960_s14, 1024  ;;  %s1445_s17 = scalar_lea.hbm %s2095_s9, 4096 }
 0x1ad   : > { %p1442_p8 = scmp.ne.s32.totalorder %s1960_s14, %s1441_s29  ;;  %p1446_p5 = scmp.lt.u32.totalorder %s1960_s14, %s2095_s9 }
 0x1ae   : > { %p1447_p4 = scmp.lt.u32.totalorder %s1445_s17, %s1441_s29  ;;  %p1449_p13 = scmp.lt.u32.totalorder %s1441_s29, %s1960_s14 }
 0x1af   : > { %p1443_p7 = pnand %p1442_p8, %p2096_p10 }
 0x1b0   : > { %p1448_p2 = por %p1447_p4, %p1446_p5 }
 0x1b1   : > { %p1444_p1 = pneg %p1443_p7 }
 0x1b2   : > { %p1450_p9 = por %p1449_p13, %p1448_p2 }
 0x1b4   : > { %p1451_p3 = pnand %p1450_p9, %p1444_p1 }
 0x1b6   : > { %1454 = shalt.err (!%p1451_p3)
}
 0x1b7   : > { %s1586_s22 = smov 64   ;;  %s1587_s1 = smov 4  }
 0x1b8   : > { %1218 = dma.vmem_to_hbm [thread:$0]  (%p2096_p10), %s1963_s11, 1024, %s1960_s14, %s1967_s4, %s1586_s22, %s1586_s22, %s1587_s1  }
 0x1b9 PF: > { %s2097_s0 = sld [smem:[#allocation12_spill]]  ;;  %p1232_p6 = scmp.ge.s32.totalorder %s1577_s8, 2 }
 0x1ba   : > { %p2098_p11 = scmp.ne.s32.totalorder %s2082_s5, 0 }
 0x1bc   : > { %p1228_p12 = pnand %p1232_p6, %p2098_p11 }
 0x1bf   : > { %s883_s10 = sand.u32 1, %s2097_s0  }
 0x1c0   : > { %s884_s6 = scalar_lea.sflag [#allocation5], %s883_s10 }
 0x1c1   : > { %1520 = dma.done.wait (!%p1228_p12), %s884_s6, 1024  }
 0x1c2   : > { %1522 = vsyncadd (!%p1228_p12), %s884_s6, 4294966272  ;;  %s25_s8 = sadd.s32 1, %s1577_s8   ;;  %s2100_s5 = sld [smem:[#allocation15_spill]] }
 0x1c3   : > { %p1996_p0 = scmp.ge.s32.totalorder %s25_s8, 10   ;;  %s2101_s14 = sld [smem:[#allocation16_spill]] }
 0x1c4   : > { %s2102_s21 = smov %s1529_s2  ;;  %s2103_s2 = smov %s1533_s3 }
 0x1c5   : > { %s2104_s3 = smov %s1724_s18  ;;  %s2105_s22 = smov %s1541_s23 }
 0x1c6   : > { %s2106_s23 = smov %s1545_s24  ;;  %s2107_s24 = smov %s1790_s15 }
 0x1c7   : > { %s2108_s25 = smov %s1553_s26  ;;  %s2109_s26 = smov %s1557_s27 }
 0x1c8   : > { %s2110_s27 = smov %s1727_s19  ;;  %s2111_s28 = smov %s1569_s30 }
 0x1c9   : > { %s2112_s29 = smov %s1573_s7  ;;  %s2113_s30 = smov %s2100_s5 }
 0x1ca   : > { %s2114_s7 = smov %s2101_s14  ;;  %24 = sbr.rel (!%p1996_p0) target bundleno = 18 (0x12), region = 122 }
 0x1d1   :  { %889 = vsyncpa [#allocation4], 1 }
 0x1d2   :  { %891 = vsyncpa [#allocation4 + $0x1], 1 }
 0x1d3   :  { %892 = vsyncpa [#allocation7], 1 }
 0x1d4   :  { %894 = vsyncpa [#allocation7 + $0x1], 1 }
 0x1d5   :  { %895 = vsyncpa [#allocation5], 1 }
 0x1d6   :  { %897 = vsyncpa [#allocation5 + $0x1], 1 }

</bundles_post_ra>
